<compile_context>
chip_gen: v5e
topology: v5e:2x2
jax: 0.10.0
libtpu: 0.0.40
codegen_flags: <defaults>
</compile_context>

<pallas_src>
import functools

import jax
import jax.numpy as jnp
from jax.experimental import pallas as pl
from jax.experimental.pallas import tpu as pltpu


def rnn_chunk_kernel(x_ref, whh_ref, hid_ref, *, chunk):
    """One grid step == `chunk` time steps of one batch block.

    x_ref   : (T, B_blk, H)  pre-gathered x-projection chunk (pipelined stream)
    whh_ref : (H, H)         W_hh^T, constant index map -> resident in VMEM
    hid_ref : (B_blk, H) f32 output block; constant index map over the time axis
                             => stays resident and doubles as the hidden carry.
    """
    c = pl.program_id(1)                      # time-chunk index (axis 1 of the grid)

    @pl.when(c == 0)
    def _():
        hid_ref[...] = jnp.zeros_like(hid_ref)

    whh = whh_ref[...]                        # hoisted load (resident weight)

    def step(j, h):
        # Per-step load from the VMEM input block: only x_t is live per iteration.
        x_t = x_ref[j].astype(jnp.float32)                              # (B_blk, H)
        hw = jnp.dot(h.astype(whh.dtype), whh,
                     preferred_element_type=jnp.float32)                # MXU, f32 acc
        return jnp.tanh(x_t + hw)                                       # f32 carry

    # Short fixed trip count -> fully unrolled for LLO scheduler visibility.
    hid_ref[...] = jax.lax.fori_loop(0, chunk, step, hid_ref[...], unroll=True)


def encoder_forward(x_ids, emb_table, w_ih, w_hh, b_ih, b_hh, *,
                    time_chunk=32, param_dtype=jnp.bfloat16, batch_blocks=None):
    """Reproduces: output, hidden = rnn(embedding(x)); return hidden  (shape (1, B, H))."""
    S, B = x_ids.shape
    H = w_hh.shape[0]
    f32 = jnp.float32

    # ---- Parameter-only precompute: embedding + input projection + both biases
    # fold into a single (V, H) table. ----
    eproj = emb_table.astype(f32) @ w_ih.T.astype(f32) + (b_ih + b_hh).astype(f32)

    # ---- Gather the per-token rows OUTSIDE the kernel (one XLA gather); the
    # kernel then streams lane-dense (T, B, H) chunks. ----
    xproj = jnp.take(eproj, x_ids.astype(jnp.int32), axis=0)            # (S, B, H) f32

    # Pad batch to a multiple of 8 (f32 sublane density). Padded rows are zeros,
    # their recurrence stays at 0 and they are sliced off at the end.
    B_pad = -(-B // 8) * 8
    if B_pad != B:
        xproj = jnp.pad(xproj, ((0, 0), (0, B_pad - B), (0, 0)))

    # Time chunking.  LEFT-pad with zero steps: h starts at 0 and
    # tanh(0 + 0 @ W_hh^T) == 0, so leading zero steps are exact no-ops -> no
    # per-step ragged masking inside the kernel.
    T = max(1, min(time_chunk, S))
    n_chunks = -(-S // T)
    S_pad = n_chunks * T
    if S_pad != S:
        xproj = jnp.pad(xproj, ((S_pad - S, 0), (0, 0), (0, 0)))
    xproj = xproj.astype(param_dtype)                                   # stream in bf16 by default

    # bf16 weight for the recurrent matmul (f32 accumulation in the kernel).
    whh_t = w_hh.T.astype(param_dtype)

    # Optional 2-way batch split on a leading "parallel" grid axis (v7x 2 TCs).
    if batch_blocks is None:
        batch_blocks = 2 if (B_pad % 16 == 0) else 1
    if B_pad % (batch_blocks * 8) != 0:
        batch_blocks = 1
    B_blk = B_pad // batch_blocks

    # VMEM budget: double-buffered x chunk + double-buffered W_hh^T + hidden carry.
    esize = jnp.dtype(param_dtype).itemsize
    est = 2 * T * B_blk * H * esize + 2 * H * H * esize + 2 * B_blk * H * 4
    vmem_limit = int(min(64 * 2**20, max(4 * 2**20, 4 * est)))

    kernel = functools.partial(rnn_chunk_kernel, chunk=T)

    hidden = pl.pallas_call(
        kernel,
        out_shape=jax.ShapeDtypeStruct((B_pad, H), jnp.float32),
        grid_spec=pltpu.PrefetchScalarGridSpec(
            num_scalar_prefetch=0,
            grid=(batch_blocks, n_chunks),          # (batch parallel, time sequential)
            in_specs=[
                # Streamed x-projection chunk: lane dim = H, sublane dim = B_blk.
                pl.BlockSpec((T, B_blk, H), lambda b, c: (c, b, 0)),
                # Resident recurrent weight.
                pl.BlockSpec((H, H), lambda b, c: (0, 0)),
            ],
            out_specs=pl.BlockSpec((B_blk, H), lambda b, c: (b, 0)),    # resident h carry
        ),
        compiler_params=pltpu.CompilerParams(
            dimension_semantics=("parallel", "arbitrary"),
            vmem_limit_bytes=vmem_limit,
        ),
    )(xproj, whh_t)

    return hidden[:B][None]                                             # (1, B, H)


def encoder_forward_ref(x_ids, emb_table, w_ih, w_hh, b_ih, b_hh):
    """Pure-JAX reference of the same recurrence (correctness check)."""
    emb = jnp.take(emb_table, x_ids, axis=0)                            # (S, B, E)
    S, B, _ = emb.shape
    H = w_hh.shape[0]
    h = jnp.zeros((B, H), jnp.float32)
    for t in range(S):
        h = jnp.tanh(emb[t] @ w_ih.T + b_ih + h @ w_hh.T + b_hh)
    return h[None]


if __name__ == "__main__":
    # Small deterministic shapes consistent with the module.
    inpDim = 16            # vocab
    embeddingSize = 32
    hiddenDim = 32
    seq_len = 10
    batch = 4

    key = jax.random.PRNGKey(0)
    k_emb, k_wih, k_whh, k_bih, k_bhh, k_x = jax.random.split(key, 6)

    # PyTorch-like init: embedding ~ N(0,1), RNN params ~ U(-1/sqrt(H), 1/sqrt(H)).
    scale = 1.0 / jnp.sqrt(jnp.float32(hiddenDim))
    emb_table = jax.random.normal(k_emb, (inpDim, embeddingSize), jnp.float32)
    w_ih = jax.random.uniform(k_wih, (hiddenDim, embeddingSize), jnp.float32, -scale, scale)
    w_hh = jax.random.uniform(k_whh, (hiddenDim, hiddenDim), jnp.float32, -scale, scale)
    b_ih = jax.random.uniform(k_bih, (hiddenDim,), jnp.float32, -scale, scale)
    b_hh = jax.random.uniform(k_bhh, (hiddenDim,), jnp.float32, -scale, scale)

    x_ids = jax.random.randint(k_x, (seq_len, batch), 0, inpDim, jnp.int32)
    ref = encoder_forward_ref(x_ids, emb_table, w_ih, w_hh, b_ih, b_hh)

    # 1) f32 params: exact path (ragged left-padded chunks + batch padding exercised).
    hid_f32 = encoder_forward(x_ids, emb_table, w_ih, w_hh, b_ih, b_hh,
                              time_chunk=4, param_dtype=jnp.float32)
    hid_f32 = jax.block_until_ready(hid_f32)
    assert hid_f32.shape == (1, batch, hiddenDim)
    assert jnp.allclose(hid_f32, ref, atol=2e-5, rtol=2e-5)

    # 2) bf16 weight / bf16 x-stream (the perf default): looser tolerance.
    hid_bf16 = encoder_forward(x_ids, emb_table, w_ih, w_hh, b_ih, b_hh,
                               time_chunk=4, param_dtype=jnp.bfloat16)
    hid_bf16 = jax.block_until_ready(hid_bf16)
    assert hid_bf16.shape == (1, batch, hiddenDim)
    assert jnp.allclose(hid_bf16, ref, atol=3e-2, rtol=3e-2)

    # 3) Larger batch to exercise the 2-way "parallel" batch grid axis (megacore path).
    x_ids16 = jax.random.randint(jax.random.PRNGKey(1), (seq_len, 16), 0, inpDim, jnp.int32)
    ref16 = encoder_forward_ref(x_ids16, emb_table, w_ih, w_hh, b_ih, b_hh)
    hid16 = encoder_forward(x_ids16, emb_table, w_ih, w_hh, b_ih, b_hh,
                            time_chunk=8, param_dtype=jnp.float32)
    hid16 = jax.block_until_ready(hid16)
    assert jnp.allclose(hid16, ref16, atol=2e-5, rtol=2e-5)

    print("KERNEL_OK")
</pallas_src>

<mosaic_0001>
module attributes {stable_mosaic.version = 11 : i64} {
  func.func @rnn_chunk_kernel(%arg0: i32, %arg1: i32, %arg2: memref<4x8x32xf32, #tpu.memory_space<vmem>>, %arg3: memref<32x32xf32, #tpu.memory_space<vmem>>, %arg4: memref<8x32xf32, #tpu.memory_space<vmem>>) attributes {dimension_semantics = [#tpu.dimension_semantics<parallel>, #tpu.dimension_semantics<arbitrary>], iteration_bounds = array<i64: 1, 3>, scalar_prefetch = 0 : i64, scratch_operands = 0 : i64, tpu.core_type = #tpu.core_type<tc>, window_params = [{transform_indices = @transform_0, window_bounds = array<i64: 4, 8, 32>}, {pipeline_mode = #tpu.pipeline_mode<synchronous>, transform_indices = @transform_1, window_bounds = array<i64: 32, 32>}, {transform_indices = @transform_2, window_bounds = array<i64: 8, 32>}]} {
    %c0_i32 = arith.constant 0 : i32
    %0 = arith.cmpi eq, %arg1, %c0_i32 : i32
    %1 = arith.extui %0 : i1 to i32
    %c0_i32_0 = arith.constant 0 : i32
    %2 = arith.cmpi ne, %1, %c0_i32_0 : i32
    scf.if %2 {
      %cst_18 = arith.constant 0.000000e+00 : f32
      %30 = vector.broadcast %cst_18 : f32 to vector<8x32xf32>
      %c0_19 = arith.constant 0 : index
      %c0_20 = arith.constant 0 : index
      %31 = vector.load %arg4[%c0_19, %c0_20] : memref<8x32xf32, #tpu.memory_space<vmem>>, vector<8x32xf32>
      tpu.vector_store %arg4[%c0_19, %c0_20], %30 {strides = array<i32>} : memref<8x32xf32, #tpu.memory_space<vmem>>, vector<8x32xf32>,
    } else {
    }
    %c0 = arith.constant 0 : index
    %c0_1 = arith.constant 0 : index
    %3 = vector.load %arg3[%c0, %c0_1] : memref<32x32xf32, #tpu.memory_space<vmem>>, vector<32x32xf32>
    %c0_2 = arith.constant 0 : index
    %c0_3 = arith.constant 0 : index
    %4 = vector.load %arg4[%c0_2, %c0_3] : memref<8x32xf32, #tpu.memory_space<vmem>>, vector<8x32xf32>
    %c0_i32_4 = arith.constant 0 : i32
    %5 = arith.index_cast %c0_i32_4 : i32 to index
    %c0_5 = arith.constant 0 : index
    %c0_6 = arith.constant 0 : index
    %6 = vector.load %arg2[%5, %c0_5, %c0_6] : memref<4x8x32xf32, #tpu.memory_space<vmem>>, vector<1x8x32xf32>
    %7 = vector.shape_cast %6 : vector<1x8x32xf32> to vector<8x32xf32>
    %cst = arith.constant dense<0.000000e+00> : vector<8x32xf32>
    %8 = tpu.matmul %4, %3, %cst {dimension_numbers = #tpu.dot_dimension_numbers<[1], [0], [0], [1], [0, 0, 1, 1], [], []>} : vector<8x32xf32>, vector<32x32xf32>, vector<8x32xf32> -> vector<8x32xf32>
    %9 = arith.addf %7, %8 : vector<8x32xf32>
    %10 = math.tanh %9 : vector<8x32xf32>
    %c1_i32 = arith.constant 1 : i32
    %11 = arith.index_cast %c1_i32 : i32 to index
    %c0_7 = arith.constant 0 : index
    %c0_8 = arith.constant 0 : index
    %12 = vector.load %arg2[%11, %c0_7, %c0_8] : memref<4x8x32xf32, #tpu.memory_space<vmem>>, vector<1x8x32xf32>
    %13 = vector.shape_cast %12 : vector<1x8x32xf32> to vector<8x32xf32>
    %cst_9 = arith.constant dense<0.000000e+00> : vector<8x32xf32>
    %14 = tpu.matmul %10, %3, %cst_9 {dimension_numbers = #tpu.dot_dimension_numbers<[1], [0], [0], [1], [0, 0, 1, 1], [], []>} : vector<8x32xf32>, vector<32x32xf32>, vector<8x32xf32> -> vector<8x32xf32>
    %15 = arith.addf %13, %14 : vector<8x32xf32>
    %16 = math.tanh %15 : vector<8x32xf32>
    %c2_i32 = arith.constant 2 : i32
    %17 = arith.index_cast %c2_i32 : i32 to index
    %c0_10 = arith.constant 0 : index
    %c0_11 = arith.constant 0 : index
    %18 = vector.load %arg2[%17, %c0_10, %c0_11] : memref<4x8x32xf32, #tpu.memory_space<vmem>>, vector<1x8x32xf32>
    %19 = vector.shape_cast %18 : vector<1x8x32xf32> to vector<8x32xf32>
    %cst_12 = arith.constant dense<0.000000e+00> : vector<8x32xf32>
    %20 = tpu.matmul %16, %3, %cst_12 {dimension_numbers = #tpu.dot_dimension_numbers<[1], [0], [0], [1], [0, 0, 1, 1], [], []>} : vector<8x32xf32>, vector<32x32xf32>, vector<8x32xf32> -> vector<8x32xf32>
    %21 = arith.addf %19, %20 : vector<8x32xf32>
    %22 = math.tanh %21 : vector<8x32xf32>
    %c3_i32 = arith.constant 3 : i32
    %23 = arith.index_cast %c3_i32 : i32 to index
    %c0_13 = arith.constant 0 : index
    %c0_14 = arith.constant 0 : index
    %24 = vector.load %arg2[%23, %c0_13, %c0_14] : memref<4x8x32xf32, #tpu.memory_space<vmem>>, vector<1x8x32xf32>
    %25 = vector.shape_cast %24 : vector<1x8x32xf32> to vector<8x32xf32>
    %cst_15 = arith.constant dense<0.000000e+00> : vector<8x32xf32>
    %26 = tpu.matmul %22, %3, %cst_15 {dimension_numbers = #tpu.dot_dimension_numbers<[1], [0], [0], [1], [0, 0, 1, 1], [], []>} : vector<8x32xf32>, vector<32x32xf32>, vector<8x32xf32> -> vector<8x32xf32>
    %27 = arith.addf %25, %26 : vector<8x32xf32>
    %28 = math.tanh %27 : vector<8x32xf32>
    %c4_i32 = arith.constant 4 : i32
    %c0_16 = arith.constant 0 : index
    %c0_17 = arith.constant 0 : index
    %29 = vector.load %arg4[%c0_16, %c0_17] : memref<8x32xf32, #tpu.memory_space<vmem>>, vector<8x32xf32>
    tpu.vector_store %arg4[%c0_16, %c0_17], %28 {strides = array<i32>} : memref<8x32xf32, #tpu.memory_space<vmem>>, vector<8x32xf32>,
    return
  }
  func.func @transform_0(%arg0: i32, %arg1: i32) -> (i32, i32, i32) {
    %c0_i32 = arith.constant 0 : i32
    %c0_i32_0 = arith.constant 0 : i32
    return %arg1, %arg0, %c0_i32 : i32, i32, i32
  }
  func.func @transform_1(%arg0: i32, %arg1: i32) -> (i32, i32) {
    %c0_i32 = arith.constant 0 : i32
    %c0_i32_0 = arith.constant 0 : i32
    %c0_i32_1 = arith.constant 0 : i32
    return %c0_i32, %c0_i32_0 : i32, i32
  }
  func.func @transform_2(%arg0: i32, %arg1: i32) -> (i32, i32) {
    %c0_i32 = arith.constant 0 : i32
    %c0_i32_0 = arith.constant 0 : i32
    return %arg0, %c0_i32 : i32, i32
  }
}

</mosaic_0001>

<bundles_post_ra>
// kernel: tpu_custom_call.1
= control target key start
LH: loop header
LB: loop body
LE: loop exit
PB: predicated region body
PF: predicated region fallthrough
CT: control target
= control target key end

     0   :  { %7 = vsyncpa [#allocation3], 0  ;;  %s794_s0 = inlined_call_operand.hbm [shape: f32[12,8,32], index: 0, kind: input, shape index: {}]   ;;  %s795_s1 = inlined_call_operand.hbm [shape: f32[32,32], index: 1, kind: input, shape index: {}]   ;;  %s796_s2 = inlined_call_operand.hbm [shape: f32[8,32], index: 2, kind: output, shape index: {}]  }
   0x1   :  { %9 = vsyncpa [#allocation3 + $0x1], 0 }
   0x2   :  { %10 = vsyncpa [#allocation6], 0 }
   0x3   :  { %11 = vsyncpa [#allocation4], 0  ;;  %s669_s9 = smov 0   ;;  %s671_s10 = smov 0  }
   0x4   :  { %s673_s11 = smov 0   ;;  %s675_s12 = smov 0  }
   0x5   :  { %s677_s13 = smov 0   ;;  %s679_s14 = smov 0  }
   0x6 LB: > { %s394_s15 = sadd.s32 4294967295, %s647_s14   ;;  %p51_p0 = scmp.ne.s32.totalorder %s631_s10, %s627_s9  ;;  %s647_s14 = sphi %s679_s14, %s17_s14   ;;  %s643_s13 = sphi %s677_s13, %s805_s13   ;;  %s639_s12 = sphi %s675_s12, %s804_s12   ;;  %s635_s11 = sphi %s673_s11, %s803_s11   ;;  %s631_s10 = sphi %s671_s10, %s802_s10   ;;  %s627_s9 = sphi %s669_s9, %s801_s9  }
   0x7   : > { %p701_p1 = scmp.eq.s32.totalorder %s394_s15, 0  ;;  %p395_p2 = scmp.ge.s32.totalorder %s647_s14, 1 }
   0x8   : > { %p109_p3 = scmp.lt.s32.totalorder %s647_s14, 4  ;;  %s120_s20 = sshll.u32 %s795_s1, 4  ;;  %s121_s20 = int_to_ptr.hbm [resolvable:$true] %s120_s20 }
   0x9   : > { %p709_p4 = por %p701_p1, %p51_p0  ;;  %s649_s22 = smov [#allocation5]  }
   0xa   : > { %p716_p5 = pnand %p395_p2, %p109_p3  ;;  %s122_s23 = sshll.u32 %s649_s22, 4  ;;  %s123_s23 = int_to_ptr.vmem [resolvable:$true] %s122_s23 }
   0xb   : > { %s650_s24 = smov 128   ;;  %s651_s25 = smov 8  }
   0xc   : > { %p427_p6 = pneg %p716_p5  ;;  %s26_s26 = sadd.s32 1, %s643_s13 }
   0xd   : > { %p27_p8 = scmp.ge.s32.totalorder %s26_s26, 3  ;;  %p45_p9 = scmp.ne.s32.totalorder %s635_s11, %s631_s10 }
   0xe   : > { %p428_p7 = pnand %p427_p6, %p701_p1  ;;  %p46_p10 = scmp.eq.s32.totalorder %s647_s14, 0 }
   0xf   : > { %s807_s26 = smov (%p27_p8, %s26_s26), 0  ;;  %s38_s27 = sadd.s32 1, %s635_s11 }
  0x10   : > { %430 = dma.hbm_to_vmem [thread:$0]  (!%p428_p7), %s121_s20, 512, %s123_s23, [#allocation6], %s650_s24, %s650_s24, %s651_s25  }
  0x11   : > { %p731_p11 = por %p46_p10, %p45_p9  ;;  %s33_s29 = ssub.s32 %s643_s13, %s807_s26 }
  0x12   : > { %s136_s30 = sand.u32 1, %s635_s11   ;;  %p36_p12 = scmp.eq.s32.totalorder %s33_s29, 0 }
  0x13   : > { %p436_p13 = scmp.lt.s32.totalorder %s647_s14, 3  ;;  %s398_s3 = sshll.u32 %s136_s30, 5 }
  0x14   : > { %s416_s4 = sshll.u32 %s643_s13, 5  ;;  %s140_s18 = scalar_lea.vmem [#allocation2], %s398_s3 }
  0x15   : > { %s741_s5 = scalar_select %p36_p12, %s635_s11, %s38_s27  }
  0x16   : > { %s146_s8 = scalar_lea.hbm %s794_s0, %s416_s4  ;;  %s149_s19 = sshll.u32 %s140_s18, 4  ;;  %s150_s19 = int_to_ptr.vmem [resolvable:$true] %s149_s19 }
  0x17   : > { %s147_s9 = sshll.u32 %s146_s8, 4  ;;  %p432_p0 = pnand %p436_p13, %p731_p11  ;;  %s148_s9 = int_to_ptr.hbm [resolvable:$true] %s147_s9 }
  0x18   : > { %s137_s20 = scalar_lea.sflag [#allocation3], %s136_s30  ;;  %161 = sbr.rel (%p716_p5) target bundleno = 605 (0x25d), region = 28 }
  0x19   : > { %434 = dma.hbm_to_vmem [thread:$0]  (!%p432_p0), %s148_s9, 512, %s150_s19, %s137_s20, %s650_s24, %s650_s24, %s651_s25  }
  0x1a   : > { %s163_s22 = sand.u32 (!%p716_p5), 1, %s631_s10  }
  0x1b   : > { %s402_s23 = sshll.u32 (!%p716_p5), %s163_s22, 5  ;;  %s164_s27 = scalar_lea.sflag (!%p716_p5), [#allocation3], %s163_s22 }
  0x1c   : > { %s751_s29 = scalar_lea.vmem (!%p716_p5), [#allocation2], %s402_s23 }
  0x1d   : > { %614 = dma.done.wait (%p709_p4), %s164_s27, 512  }
  0x1e   : > { %616 = vsyncadd (%p709_p4), %s164_s27, 4294966784 }
  0x1f   : > { %618 = dma.done.wait (%p701_p1), [#allocation6], 512  }
  0x20   : > { %620 = vsyncadd (%p701_p1), [#allocation6], 4294966784  ;;  %p404_p2 = scmp.ne.s32.totalorder %s639_s12, 0 }
  0x22   : > { %193 = sbr.rel (%p404_p2) target bundleno = 41 (0x29), region = 40 }
  0x27   : > { %vm194_vm0 = vcmask 261120   ;;  %v652_v0 = vmov 0.0  }
  0x28   : > { %195 = vst.msk [vmem:[#allocation7] sm:$0xff] %vm194_vm0, %v652_v0 }
  0x29 PF: > { %v199_v1 = vld [vmem:[#allocation5 + $0x18] sm:$0xff]  ;;  %v198_v2 = vld [vmem:[#allocation5 + $0x10] sm:$0xff]  ;;  %v197_v3 = vld [vmem:[#allocation5 + $0x8] sm:$0xff]  ;;  %vm202_vm1 = vcmask 261120   ;;  %s653_s12 = smov [#allocation7]   ;;  %s320_s24 = sshll.u32 %s796_s2, 4  ;;  %s321_s24 = int_to_ptr.hbm [resolvable:$true] %s320_s24 }
  0x2a   : > { %218 = vmatpush.msra.mxu0 %v199_v1  ;;  %245 = vmatpush.msra.mxu1 %v199_v1  ;;  %v196_v4 = vld [vmem:[#allocation5] sm:$0xff]  ;;  %v406_v10 = vld [vmem:[%s751_s29 + $0x8] sm:$0xff]  ;;  %v408_v14 = vld [vmem:[%s751_s29 + $0x10] sm:$0xff]  ;;  %s318_s16 = sshll.u32 %s653_s12, 4  ;;  %p438_p1 = scmp.eq.s32.totalorder %s394_s15, 2  ;;  %s319_s16 = int_to_ptr.vmem [resolvable:$true] %s318_s16 }
  0x2b   : > { %272 = vmatpush.msra.mxu2 %v199_v1  ;;  %299 = vmatpush.msra.mxu3 %v199_v1  ;;  %v201_v6 = vld [vmem:[%s751_s29] sm:$0xff]  ;;  %v410_v18 = vld [vmem:[%s751_s29 + $0x18] sm:$0xff] }
  0x2c   : > { %219 = vmatpush.msra.mxu0 %v198_v2  ;;  %246 = vmatpush.msra.mxu1 %v198_v2 }
  0x2d   : > { %273 = vmatpush.msra.mxu2 %v198_v2  ;;  %300 = vmatpush.msra.mxu3 %v198_v2 }
  0x2e   : > { %220 = vmatpush.msra.mxu0 %v197_v3  ;;  %247 = vmatpush.msra.mxu1 %v197_v3 }
  0x2f   : > { %v200_v5 = vld [vmem:[#allocation7] sm:$0xff]  ;;  %274 = vmatpush.msra.mxu2 %v197_v3  ;;  %301 = vmatpush.msra.mxu3 %v197_v3 }
  0x30   : > { %221 = vmatpush.msra.mxu0 %v196_v4  ;;  %248 = vmatpush.msra.mxu1 %v196_v4 }
  0x31   : > { %405 = vmatmul.msk.f32.vlgmr.msra.gmra.mxu0 %vm202_vm1, %v200_v5  ;;  %275 = vmatpush.msra.mxu2 %v196_v4 }
  0x32   : > { %302 = vmatpush.msra.mxu3 %v196_v4 }
  0xae   : > { %v223_v7 = vpop.f32.mrf.mxu0 }
  0xaf   : > { %v226_v8 = vadd.f32 %v223_v7, %v201_v6 }
  0xb1   : > { %493 = vtanh.f32 %v226_v8 }
  0xb7   : > { %v494_v9 = vpop.eup %493 }
  0xb8   : > { %407 = vmatmul.msk.f32.vlgmr.msra.gmra.mxu1 %vm202_vm1, %v494_v9 }
 0x135   : > { %v250_v11 = vpop.f32.mrf.mxu1 }
 0x136   : > { %v253_v12 = vadd.f32 %v406_v10, %v250_v11 }
 0x138   : > { %495 = vtanh.f32 %v253_v12 }
 0x13e   : > { %v496_v13 = vpop.eup %495 }
 0x13f   : > { %409 = vmatmul.msk.f32.vlgmr.msra.gmra.mxu2 %vm202_vm1, %v496_v13 }
 0x1c2   : > { %v277_v15 = vpop.f32.mrf.mxu2 }
 0x1c3   : > { %v280_v16 = vadd.f32 %v408_v14, %v277_v15 }
 0x1c5   : > { %497 = vtanh.f32 %v280_v16 }
 0x1cb   : > { %v498_v17 = vpop.eup %497 }
 0x1cc   : > { %411 = vmatmul.msk.f32.vlgmr.msra.gmra.mxu3 %vm202_vm1, %v498_v17 }
 0x24f   : > { %v304_v19 = vpop.f32.mrf.mxu3 }
 0x250   : > { %v307_v20 = vadd.f32 %v410_v18, %v304_v19 }
 0x252   : > { %499 = vtanh.f32 %v307_v20 }
 0x258   : > { %v500_v21 = vpop.eup %499 }
 0x259   : > { %309 = vst.msk [vmem:[#allocation7] sm:$0xff] %vm202_vm1, %v500_v21 }
 0x25a   : > { %424 = dma.vmem_to_hbm [thread:$0]  (%p438_p1), %s319_s16, 128, %s321_s24, [#allocation4]  }
 0x25b   : > { %622 = dma.done.wait (%p438_p1), [#allocation4], 128  }
 0x25c   : > { %624 = vsyncadd (%p438_p1), [#allocation4], 4294967168 }
 0x25d PF: > { %s17_s14 = sadd.s32 1, %s647_s14   ;;  %s801_s9 = smov %s631_s10 }
 0x25e   : > { %p14_p3 = scmp.ge.s32.totalorder %s17_s14, 5   ;;  %s802_s10 = smov %s635_s11 }
 0x25f   : > { %s803_s11 = smov %s741_s5  ;;  %s804_s12 = smov %s643_s13 }
 0x260   : > { %s805_s13 = smov %s807_s26  ;;  %16 = sbr.rel (!%p14_p3) target bundleno = 6 (0x6), region = 77 }
 0x265   :  { %334 = vsyncpa [#allocation3], 1 }
 0x266   :  { %336 = vsyncpa [#allocation3 + $0x1], 1 }
 0x267   :  { %337 = vsyncpa [#allocation6], 1 }
 0x268   :  { %338 = vsyncpa [#allocation4], 1 }
 0x269   :  { %340 = vsyncpa [#allocation4 + $0x1], 1 }

</bundles_post_ra>
